<compile_context>
chip_gen: v7x
topology: tpu7x:2x2x1
jax: 0.10.0
libtpu: 0.0.40
codegen_flags: <defaults>
</compile_context>

<pallas_src>
import math

import jax
import jax.numpy as jnp
from jax.experimental import pallas as pl
from jax.experimental.pallas import tpu as pltpu


def _mhsa_head_kernel(x_ref, wqkv_ref, bqkv_ref, woh_ref, bo_ref, o_ref, acc_ref):
    """Grid = (batch, head).  One head of one batch element per step."""
    h = pl.program_id(1)
    nh = pl.num_programs(1)
    hd = woh_ref.shape[2]

    x = x_ref[0].astype(jnp.bfloat16)        # (S, E)   bf16 for the MXU
    wqkv_h = wqkv_ref[0]                     # (E, 3hd) bf16, Q cols pre-scaled
    bqkv_h = bqkv_ref[0]                     # (1, 3hd) f32, Q segment pre-scaled
    woh_h = woh_ref[0]                       # (E, hd)  bf16

    # Per-head fused QKV projection: contraction over the full E width (the
    # efficient MXU matmul), f32 accumulation.
    qkv = jnp.dot(x, wqkv_h, preferred_element_type=jnp.float32) + bqkv_h  # (S, 3hd)
    q = qkv[:, 0:hd].astype(jnp.bfloat16)
    k = qkv[:, hd:2 * hd].astype(jnp.bfloat16)
    v = qkv[:, 2 * hd:3 * hd].astype(jnp.bfloat16)

    # Scores for THIS head only -> live tensor is (S, S) f32, not (nh, S, S).
    # The 1/sqrt(hd) scale is already folded into the Q weight/bias columns.
    s = jnp.einsum('qd,kd->qk', q, k, preferred_element_type=jnp.float32)

    # Softmax in f32 (v5e VPU/EUP have no bf16).  approx reciprocal goes to the
    # EUP slot; rows sum to 1 only up to a few ULP (fine for inference).
    s_max = jnp.max(s, axis=-1, keepdims=True)
    p = jnp.exp(s - s_max)
    p = p * pl.reciprocal(jnp.sum(p, axis=-1, keepdims=True), approx=True)

    att = jnp.dot(p.astype(jnp.bfloat16), v,
                  preferred_element_type=jnp.float32)          # (S, hd) f32

    # Output projection folded with the head-sum and the final transpose:
    # contract hd and emit channel-major (E, S) directly (review item #1).
    contrib = jnp.einsum('ed,qd->eq', woh_h, att.astype(jnp.bfloat16),
                         preferred_element_type=jnp.float32)   # (E, S) f32

    @pl.when(h == 0)
    def _():
        acc_ref[...] = contrib + bo_ref[0]    # bo is (E, 1): broadcast over S

    @pl.when(h > 0)
    def _():
        acc_ref[...] += contrib

    @pl.when(h == nh - 1)
    def _():
        o_ref[0] = acc_ref[...].astype(o_ref.dtype)


def pack_params(params, num_heads):
    """One-time weight packing (hoisted out of the per-call path).

    Returns:
      wqkv : (nh, E, 3*hd) bf16 — per-head [Q | K | V] slabs, pre-transposed,
             with the 1/sqrt(hd) attention scale folded into the Q columns.
      bqkv : (nh, 1, 3*hd) f32  — matching bias slabs (Q segment pre-scaled).
      woh  : (nh, E, hd)   bf16 — combine_heads weight as per-head slabs laid
             out for the 'ed,qd->eq' contraction.
      bo   : (1, E, 1)     f32  — combine_heads bias, channel-major column.
    """
    wq, bq, wk, bk, wv, bv, wo, bo = params
    E = wq.shape[0]
    assert E % num_heads == 0, "embed_size must be divisible by num_heads"
    hd = E // num_heads
    scale = 1.0 / math.sqrt(hd)

    def per_head_T(w):                       # (E_out, E_in) -> (nh, E_in, hd)
        return jnp.transpose(w.reshape(num_heads, hd, E), (0, 2, 1))

    wqkv = jnp.concatenate(
        [per_head_T(wq) * scale, per_head_T(wk), per_head_T(wv)],
        axis=2).astype(jnp.bfloat16)                              # (nh, E, 3hd)
    bqkv = jnp.concatenate(
        [bq.reshape(num_heads, 1, hd) * scale,
         bk.reshape(num_heads, 1, hd),
         bv.reshape(num_heads, 1, hd)], axis=2).astype(jnp.float32)  # (nh, 1, 3hd)
    woh = jnp.transpose(wo.reshape(E, num_heads, hd),
                        (1, 0, 2)).astype(jnp.bfloat16)           # (nh, E, hd)
    bo_col = bo.reshape(1, E, 1).astype(jnp.float32)              # (1, E, 1)
    return wqkv, bqkv, woh, bo_col


def mhsa_forward(x, packed, *, out_dtype=jnp.float32):
    """x: (B, C, H, W) with C == embed_size.  Returns (B, embed_size, H, W)."""
    wqkv, bqkv, woh, bo = packed
    nh, E, hd3 = wqkv.shape
    hd = hd3 // 3
    B, C, H, W = x.shape
    assert C == E, "channel dim must equal embed_size"
    S = H * W

    # Raw row-major reinterpretation, identical to torch.Tensor.reshape.
    x_seq = jnp.reshape(x, (B, S, E))

    # Explicit VMEM budget, sized from the actual blocks and clamped so it is
    # always valid on v7x (64 MiB physical).  On v5e/v6e it could be raised
    # toward ~100 MiB for very large S.
    out_itemsize = jnp.dtype(out_dtype).itemsize
    est = (2 * S * E * 4                       # x block (f32, double-buffered)
           + 2 * (E * 3 * hd + E * hd) * 2     # per-head weight slabs (bf16, x2 buf)
           + E * S * 4                         # f32 accumulator scratch
           + 2 * E * S * out_itemsize          # output block (double-buffered)
           + 2 * S * S * 4)                    # scores + exp temporaries
    vmem_limit = int(max(32 << 20, min(56 << 20, est * 3 // 2)))

    out_t = pl.pallas_call(
        _mhsa_head_kernel,
        out_shape=jax.ShapeDtypeStruct((B, E, S), out_dtype),
        grid=(B, nh),                          # batch parallel, head = reduction
        in_specs=[
            pl.BlockSpec((1, S, E), lambda b, h: (b, 0, 0)),        # x (resident over h)
            pl.BlockSpec((1, E, 3 * hd), lambda b, h: (h, 0, 0)),   # per-head Wqkv slab
            pl.BlockSpec((1, 1, 3 * hd), lambda b, h: (h, 0, 0)),   # per-head bqkv slab
            pl.BlockSpec((1, E, hd), lambda b, h: (h, 0, 0)),       # per-head Wo slab
            pl.BlockSpec((1, E, 1), lambda b, h: (0, 0, 0)),        # bo column
        ],
        out_specs=pl.BlockSpec((1, E, S), lambda b, h: (b, 0, 0)),  # (E, S) channel-major
        scratch_shapes=[pltpu.VMEM((E, S), jnp.float32)],           # head-sum accumulator
        compiler_params=pltpu.CompilerParams(
            dimension_semantics=("parallel", "arbitrary"),
            vmem_limit_bytes=vmem_limit),
    )(x_seq, wqkv, bqkv, woh, bo)

    # (B, E, S) -> (B, E, H, W): pure reshape, no transpose pass in the wrapper.
    return out_t.reshape(B, E, H, W)


def init_params(key, embed_size):
    """Deterministic xavier_uniform weights, zero biases (matches _init_weights)."""
    E = embed_size
    bound = (6.0 / (E + E)) ** 0.5
    keys = jax.random.split(key, 4)
    params = []
    for k in keys:
        w = jax.random.uniform(k, (E, E), jnp.float32, -bound, bound)
        b = jnp.zeros((E,), jnp.float32)
        params += [w, b]
    return tuple(params)


def mhsa_reference(x, params, num_heads):
    """Plain-JAX f32 reference mirroring the PyTorch forward, for verification."""
    wq, bq, wk, bk, wv, bv, wo, bo = params
    B, C, H, W = x.shape
    E, S = C, H * W
    hd = E // num_heads
    xs = jnp.reshape(x, (B, S, E)).astype(jnp.float32)

    def split(t):
        return jnp.transpose(t.reshape(B, S, num_heads, hd), (0, 2, 1, 3))

    q = split(xs @ wq.T + bq)
    k = split(xs @ wk.T + bk)
    v = split(xs @ wv.T + bv)
    s = jnp.einsum('bhqd,bhkd->bhqk', q, k) / (hd ** 0.5)
    p = jax.nn.softmax(s, axis=-1)
    att = jnp.einsum('bhqk,bhkd->bhqd', p, v)
    att = jnp.transpose(att, (0, 2, 1, 3)).reshape(B, S, E)
    out = att @ wo.T + bo
    return jnp.transpose(out.reshape(B, H, W, E), (0, 3, 1, 2))


if __name__ == "__main__":
    embed_size = 32
    num_heads = 4
    B, H, W = 2, 8, 8            # x: (B, embed_size, H, W), NCHW like PyTorch

    key = jax.random.PRNGKey(0)
    kx, kp = jax.random.split(key)
    x = jax.random.normal(kx, (B, embed_size, H, W), jnp.float32)
    params = init_params(kp, embed_size)

    packed = pack_params(params, num_heads)   # one-time packing (review item #10)
    out = mhsa_forward(x, packed)
    out = jax.block_until_ready(out)

    ref = mhsa_reference(x, params, num_heads)
    assert out.shape == (B, embed_size, H, W)
    # bf16 MXU operands (f32 accumulation) + approx softmax reciprocal vs a
    # pure-f32 reference: tolerance reflects bf16 rounding, not structure.
    max_err = float(jnp.max(jnp.abs(out - ref)))
    assert jnp.allclose(out, ref, atol=1e-1, rtol=1e-1), (
        f"mismatch vs reference (max abs err {max_err})")
    print("KERNEL_OK")
</pallas_src>

<mosaic_0001>
module attributes {stable_mosaic.version = 11 : i64} {
  func.func @_mhsa_head_kernel(%arg0: i32, %arg1: i32, %arg2: memref<1x64x32xf32, #tpu.memory_space<vmem>>, %arg3: memref<1x32x24xbf16, #tpu.memory_space<vmem>>, %arg4: memref<1x1x24xf32, #tpu.memory_space<vmem>>, %arg5: memref<1x32x8xbf16, #tpu.memory_space<vmem>>, %arg6: memref<1x32x1xf32, #tpu.memory_space<vmem>>, %arg7: memref<1x32x64xf32, #tpu.memory_space<vmem>>, %arg8: memref<32x64xf32, #tpu.memory_space<vmem>>) attributes {dimension_semantics = [#tpu.dimension_semantics<parallel>, #tpu.dimension_semantics<arbitrary>], iteration_bounds = array<i64: 2, 4>, scalar_prefetch = 0 : i64, scratch_operands = 1 : i64, tpu.core_type = #tpu.core_type<tc>, window_params = [{transform_indices = @transform_0, window_bounds = array<i64: 1, 64, 32>}, {transform_indices = @transform_1, window_bounds = array<i64: 1, 32, 24>}, {transform_indices = @transform_2, window_bounds = array<i64: 1, 1, 24>}, {transform_indices = @transform_3, window_bounds = array<i64: 1, 32, 8>}, {pipeline_mode = #tpu.pipeline_mode<synchronous>, transform_indices = @transform_4, window_bounds = array<i64: 1, 32, 1>}, {transform_indices = @transform_5, window_bounds = array<i64: 1, 32, 64>}]} {
    %c0 = arith.constant 0 : index
    %c0_0 = arith.constant 0 : index
    %c0_1 = arith.constant 0 : index
    %0 = vector.load %arg2[%c0, %c0_0, %c0_1] : memref<1x64x32xf32, #tpu.memory_space<vmem>>, vector<1x64x32xf32>
    %1 = vector.shape_cast %0 : vector<1x64x32xf32> to vector<64x32xf32>
    %2 = arith.truncf %1 : vector<64x32xf32> to vector<64x32xbf16>
    %c0_2 = arith.constant 0 : index
    %c0_3 = arith.constant 0 : index
    %c0_4 = arith.constant 0 : index
    %3 = vector.load %arg3[%c0_2, %c0_3, %c0_4] : memref<1x32x24xbf16, #tpu.memory_space<vmem>>, vector<1x32x24xbf16>
    %4 = vector.shape_cast %3 : vector<1x32x24xbf16> to vector<32x24xbf16>
    %c0_5 = arith.constant 0 : index
    %c0_6 = arith.constant 0 : index
    %c0_7 = arith.constant 0 : index
    %5 = vector.load %arg4[%c0_5, %c0_6, %c0_7] : memref<1x1x24xf32, #tpu.memory_space<vmem>>, vector<1x1x24xf32>
    %6 = vector.shape_cast %5 : vector<1x1x24xf32> to vector<1x24xf32>
    %c0_8 = arith.constant 0 : index
    %c0_9 = arith.constant 0 : index
    %c0_10 = arith.constant 0 : index
    %7 = vector.load %arg5[%c0_8, %c0_9, %c0_10] : memref<1x32x8xbf16, #tpu.memory_space<vmem>>, vector<1x32x8xbf16>
    %8 = vector.shape_cast %7 : vector<1x32x8xbf16> to vector<32x8xbf16>
    %cst = arith.constant dense<0.000000e+00> : vector<64x24xf32>
    %9 = tpu.matmul %2, %4, %cst {dimension_numbers = #tpu.dot_dimension_numbers<[1], [0], [0], [1], [0, 0, 1, 1], [], []>} : vector<64x32xbf16>, vector<32x24xbf16>, vector<64x24xf32> -> vector<64x24xf32>
    %10 = vector.broadcast %6 : vector<1x24xf32> to vector<64x24xf32>
    %11 = arith.addf %9, %10 : vector<64x24xf32>
    %12 = vector.extract_strided_slice %11 {offsets = [0, 0], sizes = [64, 8], strides = [1, 1]} : vector<64x24xf32> to vector<64x8xf32>
    %13 = arith.truncf %12 : vector<64x8xf32> to vector<64x8xbf16>
    %14 = vector.extract_strided_slice %11 {offsets = [0, 8], sizes = [64, 8], strides = [1, 1]} : vector<64x24xf32> to vector<64x8xf32>
    %15 = arith.truncf %14 : vector<64x8xf32> to vector<64x8xbf16>
    %16 = vector.extract_strided_slice %11 {offsets = [0, 16], sizes = [64, 8], strides = [1, 1]} : vector<64x24xf32> to vector<64x8xf32>
    %17 = arith.truncf %16 : vector<64x8xf32> to vector<64x8xbf16>
    "tpu.trace_start"() <{level = 10 : i32, message = "qd,kd->qk"}> : () -> ()
    %cst_11 = arith.constant dense<0.000000e+00> : vector<64x64xf32>
    %18 = tpu.matmul %13, %15, %cst_11 {dimension_numbers = #tpu.dot_dimension_numbers<[1], [1], [0], [0], [0, 0, 1, 0], [], []>} : vector<64x8xbf16>, vector<64x8xbf16>, vector<64x64xf32> -> vector<64x64xf32>
    "tpu.trace_stop"() : () -> ()
    %cst_12 = arith.constant dense<0xFF800000> : vector<64xf32>
    %19 = vector.multi_reduction <maximumf>, %18, %cst_12 [1] : vector<64x64xf32> to vector<64xf32>
    %20 = vector.shape_cast %19 : vector<64xf32> to vector<64x1xf32>
    %21 = vector.broadcast %20 : vector<64x1xf32> to vector<64x64xf32>
    %22 = arith.subf %18, %21 : vector<64x64xf32>
    %23 = math.exp %22 : vector<64x64xf32>
    %cst_13 = arith.constant dense<0.000000e+00> : vector<64xf32>
    %24 = vector.multi_reduction <add>, %23, %cst_13 [1] : vector<64x64xf32> to vector<64xf32>
    %25 = vector.shape_cast %24 : vector<64xf32> to vector<64x1xf32>
    %26 = tpu.reciprocal %25 {approx = true} : vector<64x1xf32> -> vector<64x1xf32>
    %27 = vector.broadcast %26 : vector<64x1xf32> to vector<64x64xf32>
    %28 = arith.mulf %23, %27 : vector<64x64xf32>
    %29 = arith.truncf %28 : vector<64x64xf32> to vector<64x64xbf16>
    %cst_14 = arith.constant dense<0.000000e+00> : vector<64x8xf32>
    %30 = tpu.matmul %29, %17, %cst_14 {dimension_numbers = #tpu.dot_dimension_numbers<[1], [0], [0], [1], [0, 0, 1, 1], [], []>} : vector<64x64xbf16>, vector<64x8xbf16>, vector<64x8xf32> -> vector<64x8xf32>
    %31 = arith.truncf %30 : vector<64x8xf32> to vector<64x8xbf16>
    "tpu.trace_start"() <{level = 10 : i32, message = "ed,qd->eq"}> : () -> ()
    %cst_15 = arith.constant dense<0.000000e+00> : vector<32x64xf32>
    %32 = tpu.matmul %8, %31, %cst_15 {dimension_numbers = #tpu.dot_dimension_numbers<[1], [1], [0], [0], [0, 0, 1, 0], [], []>} : vector<32x8xbf16>, vector<64x8xbf16>, vector<32x64xf32> -> vector<32x64xf32>
    %c0_i32 = arith.constant 0 : i32
    "tpu.trace_stop"() : () -> ()
    %33 = arith.cmpi eq, %arg1, %c0_i32 : i32
    %34 = arith.extui %33 : i1 to i32
    %c0_i32_16 = arith.constant 0 : i32
    %35 = arith.cmpi ne, %34, %c0_i32_16 : i32
    scf.if %35 {
      %c0_20 = arith.constant 0 : index
      %c0_21 = arith.constant 0 : index
      %c0_22 = arith.constant 0 : index
      %42 = vector.load %arg6[%c0_20, %c0_21, %c0_22] : memref<1x32x1xf32, #tpu.memory_space<vmem>>, vector<1x32x1xf32>
      %43 = vector.shape_cast %42 : vector<1x32x1xf32> to vector<32x1xf32>
      %44 = vector.broadcast %43 : vector<32x1xf32> to vector<32x64xf32>
      %45 = arith.addf %32, %44 : vector<32x64xf32>
      %c0_23 = arith.constant 0 : index
      %c0_24 = arith.constant 0 : index
      %46 = vector.load %arg8[%c0_23, %c0_24] : memref<32x64xf32, #tpu.memory_space<vmem>>, vector<32x64xf32>
      tpu.vector_store %arg8[%c0_23, %c0_24], %45 {strides = array<i32>} : memref<32x64xf32, #tpu.memory_space<vmem>>, vector<32x64xf32>,
    } else {
    }
    %c0_i32_17 = arith.constant 0 : i32
    %36 = arith.cmpi sgt, %arg1, %c0_i32_17 : i32
    %37 = arith.extui %36 : i1 to i32
    %c0_i32_18 = arith.constant 0 : i32
    %38 = arith.cmpi ne, %37, %c0_i32_18 : i32
    scf.if %38 {
      %c0_20 = arith.constant 0 : index
      %c0_21 = arith.constant 0 : index
      %42 = vector.load %arg8[%c0_20, %c0_21] : memref<32x64xf32, #tpu.memory_space<vmem>>, vector<32x64xf32>
      %43 = arith.addf %42, %32 : vector<32x64xf32>
      %c0_22 = arith.constant 0 : index
      %c0_23 = arith.constant 0 : index
      %44 = vector.load %arg8[%c0_22, %c0_23] : memref<32x64xf32, #tpu.memory_space<vmem>>, vector<32x64xf32>
      tpu.vector_store %arg8[%c0_22, %c0_23], %43 {strides = array<i32>} : memref<32x64xf32, #tpu.memory_space<vmem>>, vector<32x64xf32>,
    } else {
    }
    %c3_i32 = arith.constant 3 : i32
    %39 = arith.cmpi eq, %arg1, %c3_i32 : i32
    %40 = arith.extui %39 : i1 to i32
    %c0_i32_19 = arith.constant 0 : i32
    %41 = arith.cmpi ne, %40, %c0_i32_19 : i32
    scf.if %41 {
      %c0_20 = arith.constant 0 : index
      %c0_21 = arith.constant 0 : index
      %42 = vector.load %arg8[%c0_20, %c0_21] : memref<32x64xf32, #tpu.memory_space<vmem>>, vector<32x64xf32>
      %c0_22 = arith.constant 0 : index
      %c0_23 = arith.constant 0 : index
      %c0_24 = arith.constant 0 : index
      %43 = vector.load %arg7[%c0_22, %c0_23, %c0_24] : memref<1x32x64xf32, #tpu.memory_space<vmem>>, vector<1x32x64xf32>
      %44 = vector.shape_cast %43 : vector<1x32x64xf32> to vector<32x64xf32>
      %45 = vector.shape_cast %42 : vector<32x64xf32> to vector<1x32x64xf32>
      tpu.vector_store %arg7[%c0_22, %c0_23, %c0_24], %45 {strides = array<i32>} : memref<1x32x64xf32, #tpu.memory_space<vmem>>, vector<1x32x64xf32>,
    } else {
    }
    return
  }
  func.func @transform_0(%arg0: i32, %arg1: i32) -> (i32, i32, i32) {
    %c0_i32 = arith.constant 0 : i32
    %c0_i32_0 = arith.constant 0 : i32
    %c0_i32_1 = arith.constant 0 : i32
    return %arg0, %c0_i32, %c0_i32_0 : i32, i32, i32
  }
  func.func @transform_1(%arg0: i32, %arg1: i32) -> (i32, i32, i32) {
    %c0_i32 = arith.constant 0 : i32
    %c0_i32_0 = arith.constant 0 : i32
    %c0_i32_1 = arith.constant 0 : i32
    return %arg1, %c0_i32, %c0_i32_0 : i32, i32, i32
  }
  func.func @transform_2(%arg0: i32, %arg1: i32) -> (i32, i32, i32) {
    %c0_i32 = arith.constant 0 : i32
    %c0_i32_0 = arith.constant 0 : i32
    %c0_i32_1 = arith.constant 0 : i32
    return %arg1, %c0_i32, %c0_i32_0 : i32, i32, i32
  }
  func.func @transform_3(%arg0: i32, %arg1: i32) -> (i32, i32, i32) {
    %c0_i32 = arith.constant 0 : i32
    %c0_i32_0 = arith.constant 0 : i32
    %c0_i32_1 = arith.constant 0 : i32
    return %arg1, %c0_i32, %c0_i32_0 : i32, i32, i32
  }
  func.func @transform_4(%arg0: i32, %arg1: i32) -> (i32, i32, i32) {
    %c0_i32 = arith.constant 0 : i32
    %c0_i32_0 = arith.constant 0 : i32
    %c0_i32_1 = arith.constant 0 : i32
    %c0_i32_2 = arith.constant 0 : i32
    return %c0_i32, %c0_i32_0, %c0_i32_1 : i32, i32, i32
  }
  func.func @transform_5(%arg0: i32, %arg1: i32) -> (i32, i32, i32) {
    %c0_i32 = arith.constant 0 : i32
    %c0_i32_0 = arith.constant 0 : i32
    %c0_i32_1 = arith.constant 0 : i32
    return %arg0, %c0_i32, %c0_i32_0 : i32, i32, i32
  }
}

</mosaic_0001>

<bundles_post_ra>
// kernel: tpu_custom_call.1
= control target key start
LH: loop header
LB: loop body
LE: loop exit
PB: predicated region body
PF: predicated region fallthrough
CT: control target
= control target key end

     0   :  { %10 = vsyncpa [#allocation4], 0  ;;  %s1605_s0 = inlined_call_operand.vmem [shape: f32[2,64,32], index: 0, kind: input, shape index: {}]   ;;  %s1606_s1 = inlined_call_operand.vmem [shape: bf16[4,32,24], index: 1, kind: input, shape index: {}]   ;;  %s1607_s2 = inlined_call_operand.vmem [shape: f32[4,1,24], index: 2, kind: input, shape index: {}]   ;;  %s1608_s3 = inlined_call_operand.vmem [shape: bf16[4,32,8], index: 3, kind: input, shape index: {}]   ;;  %s1609_s4 = inlined_call_operand.vmem [shape: f32[1,32,1], index: 4, kind: input, shape index: {}]   ;;  %s1610_s5 = inlined_call_operand.hbm [shape: f32[2,32,64], index: 5, kind: output, shape index: {}]  }
   0x1   :  { %12 = vsyncpa [#allocation4 + $0x1], 0  ;;  %s1341_s18 = smov 0   ;;  %s1343_s19 = smov 0  }
   0x2   :  { %s1345_s20 = smov 0   ;;  %s1347_s21 = smov 0  }
   0x3   :  { %s1349_s22 = smov 0   ;;  %s1351_s23 = smov 0  }
   0x4   :  { %s1353_s24 = smov 0   ;;  %s1355_s25 = smov 0  }
   0x5 LB: > { %s960_s26 = sadd.s32 4294967295, %s1303_s25   ;;  %s961_s27 = sadd.s32 4294967294, %s1303_s25   ;;  %s1303_s25 = sphi %s1355_s25, %s18_s25   ;;  %s1299_s24 = sphi %s1353_s24, %s1626_s24   ;;  %s1295_s23 = sphi %s1351_s23, %s1625_s23   ;;  %s1291_s22 = sphi %s1349_s22, %s1624_s22   ;;  %s1287_s21 = sphi %s1347_s21, %s1623_s21   ;;  %s1283_s20 = sphi %s1345_s20, %s1622_s20   ;;  %s1279_s19 = sphi %s1343_s19, %s1621_s19   ;;  %s1275_s18 = sphi %s1341_s18, %s1620_s18  }
   0x6   : > { %s27_s28 = sadd.s32 1, %s1295_s23  ;;  %s30_s29 = sadd.s32 1, %s1299_s24 }
   0x7   : > { %p28_p0 = scmp.ge.s32.totalorder %s27_s28, 4  ;;  %p172_p1 = scmp.ne.s32.totalorder %s1283_s20, %s1279_s19 }
   0x8   : > { %p173_p2 = scmp.eq.s32.totalorder %s960_s26, 7  ;;  %p178_p4 = scmp.ne.s32.totalorder %s1279_s19, %s1275_s18 }
   0x9   : > { %s1628_s28 = smov (%p28_p0, %s27_s28), 0  ;;  %s1630_s29 = smov (!%p28_p0, %s30_s29), %s1299_s24 }
   0xa   : > { %1613 = sst [smem:[#allocation6_spill]] %s1628_s28  ;;  %p1390_p3 = por %p173_p2, %p172_p1 }
   0xb   : > { %p32_p5 = scmp.ge.s32.totalorder %s1630_s29, 2  ;;  %p179_p6 = scmp.eq.s32.totalorder %s961_s27, 7 }
   0xc   : > { %p964_p7 = scmp.ge.s32.totalorder %s1303_s25, 1  ;;  %p230_p8 = scmp.lt.s32.totalorder %s1303_s25, 9 }
   0xd   : > { %s1632_s29 = smov (%p32_p5, %s1630_s29), 0  ;;  %p1400_p9 = por %p179_p6, %p178_p4 }
   0xe   : > { %1615 = sst [smem:[#allocation7_spill]] %s1632_s29  ;;  %p231_p10 = pnand %p964_p7, %p230_p8 }
   0xf   : > { %s159_s7 = ssub.s32 %s1299_s24, %s1632_s29  ;;  %s162_s8 = sadd.s32 1, %s1283_s20  ;;  %vm329_vm0 = vcmask (!%p231_p10), 261120   ;;  %vm423_vm1 = vcmask (!%p231_p10), 64512   ;;  %vm513_vm2 = vcmask (!%p231_p10), 523264  }
  0x10   : > { %p160_p11 = scmp.eq.s32.totalorder %s159_s7, 0  ;;  %234 = sbr.rel (%p231_p10) target bundleno = 1469 (0x5bd), region = 40 }
  0x11   : > { %s1611_s10 = sand.u32 (!%p231_p10), 1, %s1279_s19   ;;  %p276_p12 = scmp.lt.s32.totalorder (!%p231_p10), %s1287_s21, 3 }
  0x12   : > { %s1408_s9 = scalar_select %p160_p11, %s1283_s20, %s162_s8  }
  0x13   : > { %s1414_s11 = sshll.u32 (!%p231_p10), %s1611_s10, 5  ;;  %p271_p13 = scmp.lt.s32.totalorder (!%p231_p10), %s1291_s22, 1 }
  0x14   : > { %p991_p0 = scmp.ne.s32.totalorder (!%p231_p10), %s1287_s21, 0 }
  0x17   : > { %s1418_s12 = scalar_select %p276_p12, %s1287_s21, 3 }
  0x18   : > { %s272_s13 = scalar_select %p271_p13, %s1291_s22, 1 }
  0x19   : > { %s1000_s14 = sshll.u32 %s1418_s12, 4 }
  0x1a   : > { %s280_s17 = scalar_lea.vmem %s1606_s1, %s1000_s14  ;;  %s1428_s7 = scalar_lea.vmem %s1608_s3, %s1000_s14 }
  0x1b   : > { %v1171_v0 = vld [vmem:[%s280_s17] sm:$0xff]   ;;  %s999_s8 = sshll.u32 %s272_s13, 6  ;;  %v1173_v1 = vld [vmem:[%s280_s17 + $0x8] sm:$0xff]   ;;  %s283_s13 = scalar_lea.vmem %s1607_s2, %s1418_s12 }
  0x1c   : > { %s275_s28 = scalar_lea.vmem %s1605_s0, %s999_s8  ;;  %1031 = vmatprep.subr.bf16.mxu1 %v1171_v0  ;;  %v972_v14 = vld [vmem:[%s283_s13] ss:$0 sm:$0xff]  ;;  %s1306_s12 = smov 112  }
  0x1d   : > { %v290_v2 = vld [vmem:[%s275_s28] sm:$0xff]  ;;  %v291_v3 = vld [vmem:[%s275_s28 + $0x8] sm:$0xff]  ;;  %1032 = vmatpush3.bf16.msra.mxu1 %v1171_v0  ;;  %v292_v5 = vld [vmem:[%s275_s28 + $0x10] sm:$0xff]  ;;  %s1509_s14 = scalar_lea.vmem [#allocation3], %s1414_s11 }
  0x1e   : > { %v298_v4 = vpack.c.bf16 %v291_v3, %v290_v2  ;;  %v293_v6 = vld [vmem:[%s275_s28 + $0x18] sm:$0xff]  ;;  %1033 = vmatprep.subr.bf16.mxu1 %v1173_v1  ;;  %v294_v7 = vld [vmem:[%s275_s28 + $0x20] sm:$0xff]  ;;  %v295_v8 = vld [vmem:[%s275_s28 + $0x28] sm:$0xff] }
  0x1f   : > { %v299_v9 = vpack.c.bf16 %v293_v6, %v292_v5  ;;  %v300_v10 = vpack.c.bf16 %v295_v8, %v294_v7  ;;  %v296_v11 = vld [vmem:[%s275_s28 + $0x30] sm:$0xff]  ;;  %v297_v12 = vld [vmem:[%s275_s28 + $0x38] sm:$0xff]  ;;  %s1305_s28 = smov 120  }
  0x20   : > { %1035 = vmatprep.mubr.msk.bf16.mxu1 %vm329_vm0, %v298_v4  ;;  %v301_v13 = vpack.c.bf16 %v297_v12, %v296_v11 }
  0x21   : > { %1034 = vmatpush3.bf16.msra.mxu1 %v1173_v1 }
  0x24   : > { %1036 = vmatmul.mubr.msk.bf16.vlgmr.msra.gmra.mrb[0].mxu1 %vm329_vm0, %v299_v9 }
  0x25   : > { %1039 = vmatprep.mubr.msk.bf16.mxu1 %vm329_vm0, %v300_v10 }
  0x2c   : > { %1040 = vmatmul.mubr.msk.bf16.gmra.mrb[4].mxu1 %vm329_vm0, %v301_v13 }
  0xf7   : > { %v1037_v15 = vpop.f32.mrb[0].mxu1 }
  0xf8   : > { %v385_v16 = vadd.f32 %v1037_v15, %v972_v14  ;;  %v376_v17 = vpop.f32.mrb[1].mxu1 }
  0xf9   : > { %v377_v18 = vadd.f32 %v972_v14, %v376_v17  ;;  %v1038_v19 = vpop.f32.mrb[2].mxu1 }
  0xfa   : > { %v388_v20 = vadd.f32 %v1038_v19, %v972_v14  ;;  %v379_v21 = vpop.f32.mrb[3].mxu1 }
  0xfb   : > { %v380_v22 = vadd.f32 %v972_v14, %v379_v21 }
  0xfc   : > { %v1441_v23 = vpack.c.bf16 %v388_v20, %v385_v16 }
  0xfd   : > { %v407_v24 = vpack.c.bf16 %v380_v22, %v377_v18 }
  0xff   : > { %415 = vrot.lane.b32.xlu0 %v407_v24, %s1305_s28  ;;  %1051 = vmatprep.mubr.msk.bf16.mxu1 %vm423_vm1, %v407_v24  ;;  %v1041_v25 = vpop.f32.mrb[4].mxu1 }
 0x100   : > { %v401_v26 = vadd.f32 %v1041_v25, %v972_v14  ;;  %v392_v27 = vpop.f32.mrb[5].mxu1 }
 0x101   : > { %v393_v28 = vadd.f32 %v972_v14, %v392_v27  ;;  %v1042_v29 = vpop.f32.mrb[6].mxu1 }
 0x102   : > { %v404_v30 = vadd.f32 %v1042_v29, %v972_v14  ;;  %v395_v31 = vpop.f32.mrb[7].mxu1 }
 0x103   : > { %v396_v32 = vadd.f32 %v972_v14, %v395_v31  ;;  %417 = vrot.lane.b32.xlu0 %v1441_v23, %s1305_s28 }
 0x104   : > { %v1445_v33 = vpack.c.bf16 %v404_v30, %v401_v26 }
 0x105   : > { %v1447_v34 = vpack.c.bf16 %v396_v32, %v393_v28 }
 0x107   : > { %419 = vrot.lane.b32.xlu1 %v1447_v34, %s1305_s28 }
 0x10b   : > { %421 = vrot.lane.b32.xlu1 %v1445_v33, %s1305_s28 }
 0x171   : > { %v416_v35 = vpop.permute.xlu0 %415 }
 0x172   : > { %v437_v36 = vsel %vm423_vm1, %v416_v35, 0  ;;  %1087 = vmatprep.subr.msk.bf16.mxu1 %vm423_vm1, %v416_v35 }
 0x173   : > { %1044 = vmatpush3.bf16.xpose.msra.mxu1 %v437_v36 }
 0x175   : > { %v418_v37 = vpop.permute.xlu0 %417 }
 0x176   : > { %1088 = vmatprep.subr.msk.bf16.mxu1 %vm423_vm1, %v418_v37  ;;  %v440_v38 = vsel %vm423_vm1, %v418_v37, 0 }
 0x179   : > { %v420_v39 = vpop.permute.xlu1 %419 }
 0x17a   : > { %v443_v40 = vsel %vm423_vm1, %v420_v39, 0 }
 0x17b   : > { %1046 = vmatpush3.bf16.xpose.msra.mxu1 %v440_v38 }
 0x17c   : > { %1089 = vmatprep.subr.msk.bf16.mxu1 %vm423_vm1, %v420_v39 }
 0x17d   : > { %v422_v41 = vpop.permute.xlu1 %421 }
 0x17e   : > { %v446_v42 = vsel %vm423_vm1, %v422_v41, 0 }
 0x183   : > { %1048 = vmatpush3.bf16.xpose.msra.mxu1 %v443_v40 }
 0x184   : > { %1090 = vmatprep.subr.msk.bf16.mxu1 %vm423_vm1, %v422_v41 }
 0x18b   : > { %1050 = vmatpush3.bf16.xpose.msra.mxu1 %v446_v42 }
 0x192   : > { %1052 = vmatmul.mubr.msk.bf16.vlgmr.msra.gmra.mrb[8].mxu1 %vm423_vm1, %v1441_v23 }
 0x193   : > { %1055 = vmatprep.mubr.msk.bf16.mxu1 %vm423_vm1, %v1447_v34 }
 0x19a   : > { %1056 = vmatmul.mubr.msk.bf16.gmra.mrb[12].mxu1 %vm423_vm1, %v1445_v33 }
 0x265   : > { %v1053_v43 = vpop.f32.mrb[8].mxu1 }
 0x266   : > { %v482_v44 = vpop.f32.mrb[9].mxu1  ;;  %v520_v49 = vsel %vm513_vm2, %v1053_v43, -inf }
 0x267   : > { %v1054_v45 = vpop.f32.mrb[10].mxu1  ;;  %v514_v46 = vsel %vm513_vm2, %v482_v44, -inf }
 0x268   : > { %515 = vmax.xlane.f32.xlu0 %v514_v46  ;;  %v485_v47 = vpop.f32.mrb[11].mxu1  ;;  %v523_v53 = vsel %vm513_vm2, %v1054_v45, -inf }
 0x269   : > { %v517_v48 = vsel %vm513_vm2, %v485_v47, -inf }
 0x26a   : > { %518 = vmax.xlane.f32.xlu1 %v517_v48 }
 0x26c   : > { %521 = vmax.xlane.f32.xlu0 %v520_v49 }
 0x26d   : > { %v1057_v50 = vpop.f32.mrb[12].mxu1 }
 0x26e   : > { %v498_v51 = vpop.f32.mrb[13].mxu1  ;;  %v532_v56 = vsel %vm513_vm2, %v1057_v50, -inf }
 0x26f   : > { %v1058_v52 = vpop.f32.mrb[14].mxu1  ;;  %v526_v54 = vsel %vm513_vm2, %v498_v51, -inf }
 0x270   : > { %524 = vmax.xlane.f32.xlu0 %v523_v53  ;;  %527 = vmax.xlane.f32.xlu1 %v526_v54  ;;  %v501_v55 = vpop.f32.mrb[15].mxu1  ;;  %v535_v58 = vsel %vm513_vm2, %v1058_v52, -inf }
 0x271   : > { %v529_v57 = vsel %vm513_vm2, %v501_v55, -inf }
 0x274   : > { %533 = vmax.xlane.f32.xlu1 %v532_v56  ;;  %530 = vmax.xlane.f32.xlu0 %v529_v57 }
 0x278   : > { %536 = vmax.xlane.f32.xlu0 %v535_v58 }
 0x285   : > { %606 = vrot.lane.b32.xlu1 %v407_v24, %s1306_s12 }
 0x289   : > { %608 = vrot.lane.b32.xlu1 %v1441_v23, %s1306_s12 }
 0x2f5   : > { %v516_v59 = vpop.xlane.xlu0 %515 }
 0x2f6   : > { %v538_v60 = vsub.f32 %v482_v44, %v516_v59 }
 0x2f7   : > { %v519_v61 = vpop.xlane.xlu1 %518 }
 0x2f8   : > { %v546_v0 = vmul.f32 1.442695, %v538_v60  ;;  %v539_v1 = vsub.f32 %v485_v47, %v519_v61 }
 0x2f9   : > { %v522_v62 = vpop.xlane.xlu0 %521 }
 0x2fa   : > { %v540_v63 = vsub.f32 %v1053_v43, %v522_v62  ;;  %v548_v6 = vmul.f32 1.442695, %v539_v1 }
 0x2fc   : > { %v550_v2 = vmul.f32 1.442695, %v540_v63 }
 0x2fd   : > { %v525_v3 = vpop.xlane.xlu0 %524  ;;  %v528_v4 = vpop.xlane.xlu1 %527 }
 0x2fe   : > { %1175 = vpow2.f32 %v550_v2  ;;  %v541_v5 = vsub.f32 %v1054_v45, %v525_v3  ;;  %v542_v11 = vsub.f32 %v498_v51, %v528_v4  ;;  %v1174_v3 = vld [vmem:[%s1428_s7] sm:$0xff]  }
 0x2ff   : > { %1177 = vpow2.f32 %v546_v0 }
 0x300   : > { %v552_v7 = vmul.f32 1.442695, %v541_v5  ;;  %v554_v16 = vmul.f32 1.442695, %v542_v11 }
 0x301   : > { %v534_v8 = vpop.xlane.xlu1 %533  ;;  %v531_v9 = vpop.xlane.xlu0 %530 }
 0x302   : > { %1179 = vpow2.f32 %v552_v7  ;;  %v544_v10 = vsub.f32 %v1057_v50, %v534_v8  ;;  %v543_v22 = vsub.f32 %v501_v55, %v531_v9 }
 0x303   : > { %1181 = vpow2.f32 %v548_v6 }
 0x304   : > { %v558_v12 = vmul.f32 1.442695, %v544_v10  ;;  %v556_v27 = vmul.f32 1.442695, %v543_v22 }
 0x305   : > { %v607_v13 = vpop.permute.xlu1 %606  ;;  %v537_v14 = vpop.xlane.xlu0 %536 }
 0x306   : > { %1059 = vmatprep.subr.bf16.mxu0 %v607_v13  ;;  %1183 = vpow2.f32 %v558_v12  ;;  %v545_v17 = vsub.f32 %v1058_v52, %v537_v14 }
 0x307   : > { %1060 = vmatpush3.bf16.msra.mxu0 %v607_v13  ;;  %1185 = vpow2.f32 %v554_v16 }
 0x308   : > { %v1476_v15 = vpop.eup %1175  ;;  %v560_v23 = vmul.f32 1.442695, %v545_v17 }
 0x309   : > { %v609_v18 = vpop.permute.xlu1 %608  ;;  %v568_v19 = vsel %vm513_vm2, %v1476_v15, 0.0  ;;  %v1178_v20 = vpop.eup %1177 }
 0x30a   : > { %569 = vadd.xlane.f32.xlu1 %v568_v19  ;;  %1061 = vmatprep.subr.bf16.mxu0 %v609_v18  ;;  %v562_v24 = vsel %vm513_vm2, %v1178_v20, 0.0  ;;  %1187 = vpow2.f32 %v560_v23 }
 0x30b   : > { %1062 = vmatpush3.bf16.msra.mxu0 %v609_v18  ;;  %1189 = vpow2.f32 %v556_v27  ;;  %v1307_v27 = vmov (!%p991_p0), 0  }
 0x30c   : > { %v1180_v21 = vpop.eup %1179  ;;  %1208 = vset.pattern.permute.xlu1 (!%p991_p0), %v1307_v27  ;;  %1207 = vset.pattern.permute.xlu0 (!%p991_p0), %v1307_v27 }
 0x30d   : > { %v571_v25 = vsel %vm513_vm2, %v1180_v21, 0.0  ;;  %v1182_v26 = vpop.eup %1181 }
 0x30e   : > { %563 = vadd.xlane.f32.xlu1 %v562_v24  ;;  %572 = vadd.xlane.f32.xlu0 %v571_v25  ;;  %v565_v28 = vsel %vm513_vm2, %v1182_v26, 0.0  ;;  %v782_v25 = vld [vmem:[%s1609_s4 + $0x10] sm:$0xff] (!%p991_p0) }
 0x310   : > { %v1184_v29 = vpop.eup %1183 }
 0x311   : > { %v580_v30 = vsel %vm513_vm2, %v1184_v29, 0.0  ;;  %v1186_v31 = vpop.eup %1185 }
 0x312   : > { %566 = vadd.xlane.f32.xlu0 %v565_v28  ;;  %v574_v32 = vsel %vm513_vm2, %v1186_v31, 0.0  ;;  %v783_v28 = vld [vmem:[%s1609_s4 + $0x18] sm:$0xff] (!%p991_p0) }
 0x314   : > { %v1188_v35 = vpop.eup %1187 }
 0x315   : > { %v583_v36 = vsel %vm513_vm2, %v1188_v35, 0.0  ;;  %v1190_v37 = vpop.eup %1189 }
 0x316   : > { %581 = vadd.xlane.f32.xlu0 %v580_v30  ;;  %v577_v38 = vsel %vm513_vm2, %v1190_v37, 0.0 }
 0x31a   : > { %575 = vadd.xlane.f32.xlu0 %v574_v32 }
 0x31e   : > { %584 = vadd.xlane.f32.xlu0 %v583_v36 }
 0x31f   : > { %612 = vrot.lane.b32.xlu1 %v1445_v33, %s1306_s12 }
 0x322   : > { %578 = vadd.xlane.f32.xlu0 %v577_v38 }
 0x323   : > { %796 = vperm.xlu1 (!%p991_p0), %1208, %v782_v25  }
 0x327   : > { %801 = vperm.xlu1 (!%p991_p0), %1208, %v783_v28  }
 0x338   : > { %610 = vrot.lane.b32.xlu0 %v1447_v34, %s1306_s12 }
 0x397   : > { %v570_v39 = vpop.xlane.xlu1 %569 }
 0x39b   : > { %v564_v40 = vpop.xlane.xlu1 %563  ;;  %v573_v41 = vpop.xlane.xlu0 %572 }
 0x39c   : > { %1191 = vrcp.f32 %v564_v40 }
 0x39f   : > { %v567_v42 = vpop.xlane.xlu0 %566  ;;  %v613_v53 = vpop.permute.xlu1 %612 }
 0x3a0   : > { %1193 = vrcp.f32 %v567_v42 }
 0x3a1   : > { %1195 = vrcp.f32 %v573_v41 }
 0x3a2   : > { %1197 = vrcp.f32 %v570_v39 }
 0x3a3   : > { %v582_v43 = vpop.xlane.xlu0 %581  ;;  %v797_v30 = vpop.permute.xlu1 (!%p991_p0), %796 }
 0x3a6   : > { %v1192_v45 = vpop.eup %1191 }
 0x3a7   : > { %v576_v44 = vpop.xlane.xlu0 %575  ;;  %v594_v33 = vmul.f32 %v1192_v45, %v1178_v20  ;;  %v1172_v20 = vld [vmem:[%s1428_s7 + $0x8] sm:$0xff]   ;;  %v802_v36 = vpop.permute.xlu1 (!%p991_p0), %801 }
 0x3a8   : > { %1199 = vrcp.f32 %v576_v44 }
 0x3aa   : > { %v1194_v46 = vpop.eup %1193 }
 0x3ab   : > { %v585_v47 = vpop.xlane.xlu0 %584  ;;  %v595_v48 = vmul.f32 %v1194_v46, %v1182_v26  ;;  %v1196_v50 = vpop.eup %1195  ;;  %v780_v26 = vld [vmem:[%s1609_s4] sm:$0xff] (!%p991_p0) }
 0x3ac   : > { %v1198_v52 = vpop.eup %1197  ;;  %v597_v54 = vmul.f32 %v1196_v50, %v1180_v21  ;;  %786 = vperm.xlu0 (!%p991_p0), %1207, %v780_v26  }
 0x3ad   : > { %v602_v49 = vpack.c.bf16 %v595_v48, %v594_v33  ;;  %v596_v56 = vmul.f32 %v1198_v52, %v1476_v15 }
 0x3af   : > { %1067 = vmatprep.mubr.msk.bf16.mxu0 %vm513_vm2, %v602_v49  ;;  %v579_v34 = vpop.xlane.xlu0 %578  ;;  %v603_v58 = vpack.c.bf16 %v597_v54, %v596_v56 }
 0x3b0   : > { %1201 = vrcp.f32 %v579_v34 }
 0x3b1   : > { %1203 = vrcp.f32 %v585_v47 }
 0x3b2   : > { %1205 = vrcp.f32 %v582_v43  ;;  %v1200_v55 = vpop.eup %1199 }
 0x3b3   : > { %v611_v51 = vpop.permute.xlu0 %610  ;;  %v598_v60 = vmul.f32 %v1200_v55, %v1186_v31 }
 0x3b4   : > { %1063 = vmatprep.subr.bf16.mxu0 %v611_v51 }
 0x3b5   : > { %1064 = vmatpush3.bf16.msra.mxu0 %v611_v51 }
 0x3b6   : > { %1065 = vmatprep.subr.bf16.mxu0 %v613_v53 }
 0x3b9   : > { %1066 = vmatpush3.bf16.msra.mxu0 %v613_v53 }
 0x3ba   : > { %v1202_v57 = vpop.eup %1201 }
 0x3bb   : > { %v1204_v59 = vpop.eup %1203  ;;  %v599_v61 = vmul.f32 %v1202_v57, %v1190_v37 }
 0x3bc   : > { %1068 = vmatmul.mubr.msk.bf16.vlgmr.msra.gmra.mrb[0].mxu0 %vm513_vm2, %v603_v58  ;;  %v1206_v62 = vpop.eup %1205  ;;  %v601_v0 = vmul.f32 %v1204_v59, %v1188_v35 }
 0x3bd   : > { %v604_v63 = vpack.c.bf16 %v599_v61, %v598_v60  ;;  %v600_v1 = vmul.f32 %v1206_v62, %v1184_v29  ;;  %v781_v29 = vld [vmem:[%s1609_s4 + $0x8] sm:$0xff] (!%p991_p0) }
 0x3be   : > { %791 = vperm.xlu0 (!%p991_p0), %1207, %v781_v29  }
 0x3bf   : > { %1071 = vmatprep.mubr.msk.bf16.mxu0 %vm513_vm2, %v604_v63  ;;  %v605_v2 = vpack.c.bf16 %v601_v0, %v600_v1 }
 0x3c4   : > { %1072 = vmatmul.mubr.msk.bf16.gmra.mrb[4].mxu0 %vm513_vm2, %v605_v2 }
 0x3c5   : > { %1083 = vmatprep.mubr.msk.bf16.mxu0 %vm423_vm1, %v1174_v3 }
 0x42b   : > { %v787_v31 = vpop.permute.xlu0 (!%p991_p0), %786 }
 0x43d   : > { %v792_v37 = vpop.permute.xlu0 (!%p991_p0), %791 }
 0x48f   : > { %v1069_v4 = vpop.f32.mrb[0].mxu0 }
 0x490   : > { %v664_v5 = vpop.f32.mrb[1].mxu0 }
 0x491   : > { %v1070_v6 = vpop.f32.mrb[2].mxu0 }
 0x492   : > { %v696_v7 = vpack.c.bf16 %v1070_v6, %v1069_v4  ;;  %v667_v8 = vpop.f32.mrb[3].mxu0 }
 0x493   : > { %v695_v9 = vpack.c.bf16 %v667_v8, %v664_v5 }
 0x494   : > { %v719_v17 = vsel %vm423_vm1, %v696_v7, 0 }
 0x495   : > { %v716_v10 = vsel %vm423_vm1, %v695_v9, 0  ;;  %1091 = vmatprep.subr.msk.bf16.mxu0 %vm423_vm1, %v695_v9 }
 0x496   : > { %1076 = vmatpush3.bf16.xpose.msra.mxu0 %v716_v10 }
 0x497   : > { %v1073_v11 = vpop.f32.mrb[4].mxu0  ;;  %1092 = vmatprep.subr.msk.bf16.mxu0 %vm423_vm1, %v696_v7 }
 0x498   : > { %v680_v12 = vpop.f32.mrb[5].mxu0 }
 0x499   : > { %v1074_v13 = vpop.f32.mrb[6].mxu0 }
 0x49a   : > { %v698_v14 = vpack.c.bf16 %v1074_v13, %v1073_v11  ;;  %v683_v15 = vpop.f32.mrb[7].mxu0 }
 0x49b   : > { %v697_v16 = vpack.c.bf16 %v683_v15, %v680_v12 }
 0x49c   : > { %v725_v19 = vsel %vm423_vm1, %v698_v14, 0 }
 0x49d   : > { %v722_v18 = vsel %vm423_vm1, %v697_v16, 0 }
 0x49e   : > { %1078 = vmatpush3.bf16.xpose.msra.mxu0 %v719_v17 }
 0x49f   : > { %1093 = vmatprep.subr.msk.bf16.mxu0 %vm423_vm1, %v697_v16 }
 0x4a6   : > { %1080 = vmatpush3.bf16.xpose.msra.mxu0 %v722_v18 }
 0x4a7   : > { %1094 = vmatprep.subr.msk.bf16.mxu0 %vm423_vm1, %v698_v14 }
 0x4ae   : > { %1082 = vmatpush3.bf16.xpose.msra.mxu0 %v725_v19 }
 0x4b5   : > { %1084 = vmatmul.mubr.msk.bf16.vlgmr.msra.gmra.mrb[8].mxu0 %vm423_vm1, %v1172_v20 }
 0x585   : > { %779 = sbr.rel (%p991_p0) target bundleno = 1423 (0x58f), region = 44 }
 0x588   : > { %v1085_v21 = vpop.f32.mrb[8].mxu0 }
 0x589   : > { %v761_v22 = vpop.f32.mrb[9].mxu0  ;;  %v806_v32 = vadd.f32 (!%p991_p0), %v1085_v21, %v797_v30 }
 0x58a   : > { %v1086_v23 = vpop.f32.mrb[10].mxu0  ;;  %v804_v35 = vadd.f32 (!%p991_p0), %v787_v31, %v761_v22 }
 0x58b   : > { %v764_v24 = vpop.f32.mrb[11].mxu0  ;;  %810 = vst.msk [vmem:[#allocation2 + $0x10] sm:$0xff] (!%p991_p0), %vm513_vm2, %v806_v32  ;;  %v807_v38 = vadd.f32 (!%p991_p0), %v1086_v23, %v802_v36 }
 0x58c   : > { %808 = vst.msk [vmem:[#allocation2] sm:$0xff] %vm513_vm2, %v804_v35  ;;  %v805_v39 = vadd.f32 %v792_v37, %v764_v24 }
 0x58d   : > { %811 = vst.msk [vmem:[#allocation2 + $0x18] sm:$0xff] %vm513_vm2, %v807_v38 }
 0x58e   : > { %809 = vst.msk [vmem:[#allocation2 + $0x8] sm:$0xff] %vm513_vm2, %v805_v39 }
 0x58f PF: > { %p992_p1 = scmp.le.s32.totalorder %s1287_s21, 0 }
 0x591   : > { %815 = sbr.rel (%p992_p1) target bundleno = 1434 (0x59a), region = 48 }
 0x594   : > { %v819_v46 = vld [vmem:[#allocation2 + $0x18] sm:$0xff] (!%p992_p1) }
 0x595   : > { %v817_v41 = vld [vmem:[#allocation2 + $0x8] sm:$0xff] (!%p992_p1)  ;;  %v818_v42 = vld [vmem:[#allocation2 + $0x10] sm:$0xff] (!%p992_p1)  ;;  %v823_v47 = vadd.f32 (!%p992_p1), %v1086_v23, %v819_v46 }
 0x596   : > { %v816_v40 = vld [vmem:[#allocation2] sm:$0xff] (!%p992_p1)  ;;  %v821_v44 = vadd.f32 (!%p992_p1), %v817_v41, %v764_v24  ;;  %v822_v45 = vadd.f32 (!%p992_p1), %v1085_v21, %v818_v42 }
 0x597   : > { %v820_v43 = vadd.f32 (!%p992_p1), %v816_v40, %v761_v22  ;;  %827 = vst.msk [vmem:[#allocation2 + $0x18] sm:$0xff] (!%p992_p1), %vm513_vm2, %v823_v47 }
 0x598   : > { %825 = vst.msk [vmem:[#allocation2 + $0x8] sm:$0xff] %vm513_vm2, %v821_v44  ;;  %826 = vst.msk [vmem:[#allocation2 + $0x10] sm:$0xff] %vm513_vm2, %v822_v45 }
 0x599   : > { %824 = vst.msk [vmem:[#allocation2] sm:$0xff] %vm513_vm2, %v820_v43 }
 0x59a PF: > { %p993_p2 = scmp.ne.s32.totalorder %s1287_s21, 3 }
 0x59c   : > { %831 = sbr.rel (%p993_p2) target bundleno = 1443 (0x5a3), region = 52 }
 0x5a0   : > { %v832_v33 = vld [vmem:[#allocation2] sm:$0xff] (!%p993_p2)  ;;  %v835_v34 = vld [vmem:[#allocation2 + $0x18] sm:$0xff] (!%p993_p2) }
 0x5a1   : > { %v833_v48 = vld [vmem:[#allocation2 + $0x8] sm:$0xff] (!%p993_p2)  ;;  %v834_v49 = vld [vmem:[#allocation2 + $0x10] sm:$0xff] (!%p993_p2)  ;;  %836 = vst.msk [vmem:[%s1509_s14] sm:$0xff] (!%p993_p2), %vm513_vm2, %v832_v33  ;;  %839 = vst.msk [vmem:[%s1509_s14 + $0x18] sm:$0xff] (!%p993_p2), %vm513_vm2, %v835_v34 }
 0x5a2   : > { %837 = vst.msk [vmem:[%s1509_s14 + $0x8] sm:$0xff] (!%p993_p2), %vm513_vm2, %v833_v48  ;;  %838 = vst.msk [vmem:[%s1509_s14 + $0x10] sm:$0xff] (!%p993_p2), %vm513_vm2, %v834_v49 }
 0x5a3 PF: > { %s1002_s21 = sshll.u32 %s1291_s22, 9  ;;  %s854_s28 = sshll.u32 %s1509_s14, 4  ;;  %s1549_s28 = int_to_ptr.vmem [resolvable:$true] %s854_s28 }
 0x5a4   : > { %s1546_s13 = scalar_lea.hbm %s1610_s5, %s1002_s21  ;;  %s1617_s12 = sand.u32 1, %s1279_s19  }
 0x5a5   : > { %s1553_s15 = scalar_lea.sflag [#allocation4], %s1617_s12  ;;  %s1209_s16 = scalar_lea.vmem %s1549_s28, 512 }
 0x5a6   : > { %p1210_p4 = scmp.ne.s32.totalorder %s1549_s28, %s1209_s16  ;;  %s1308_s22 = smov [#allocation3]  }
 0x5a7   : > { %s1213_s17 = sshll.u32 %s1308_s22, 4  ;;  %s1214_s17 = int_to_ptr.vmem [resolvable:$false] %s1213_s17 }
 0x5a8   : > { %p1211_p5 = pnand %p1210_p4, %p1390_p3  ;;  %s1215_s26 = scalar_lea.vmem %s1214_s17, 1024 }
 0x5a9   : > { %p1216_p7 = scmp.lt.s32.totalorder %s1549_s28, %s1214_s17  ;;  %p1217_p8 = scmp.lt.s32.totalorder %s1215_s26, %s1209_s16 }
 0x5aa   : > { %p1212_p6 = pneg %p1211_p5 }
 0x5ab   : > { %p1218_p10 = por %p1217_p8, %p1216_p7 }
 0x5ad   : > { %p1219_p11 = pnand %p1218_p10, %p1212_p6 }
 0x5af   : > { %1222 = shalt.err (!%p1219_p11)
}
 0x5b0   : > { %s1223_s14 = scalar_lea.hbm %s1546_s13, 512  ;;  %s1227_s11 = scalar_lea.hbm %s1610_s5, 1024 }
 0x5b1   : > { %p1224_p12 = scmp.ne.s32.totalorder %s1546_s13, %s1223_s14  ;;  %p1228_p1 = scmp.lt.u32.totalorder %s1546_s13, %s1610_s5 }
 0x5b2   : > { %p1229_p2 = scmp.lt.u32.totalorder %s1227_s11, %s1223_s14  ;;  %p1231_p5 = scmp.lt.u32.totalorder %s1223_s14, %s1546_s13 }
 0x5b3   : > { %p1225_p13 = pnand %p1224_p12, %p1390_p3 }
 0x5b4   : > { %p1230_p4 = por %p1229_p2, %p1228_p1 }
 0x5b5   : > { %p1226_p0 = pneg %p1225_p13 }
 0x5b6   : > { %p1232_p6 = por %p1231_p5, %p1230_p4 }
 0x5b8   : > { %p1233_p7 = pnand %p1232_p6, %p1226_p0 }
 0x5ba   : > { %1236 = shalt.err (!%p1233_p7)
}
 0x5bb   : > { %s1309_s29 = smov 128   ;;  %s1310_s10 = smov 8  }
 0x5bc   : > { %1095 = dma.vmem_to_hbm [thread:$0]  (%p1390_p3), %s1549_s28, 512, %s1546_s13, %s1553_s15, %s1309_s29, %s1309_s29, %s1310_s10  }
 0x5bd PF: > { %p1101_p8 = scmp.ge.s32.totalorder %s1303_s25, 2  ;;  %s869_s12 = sand.u32 1, %s1275_s18  }
 0x5be   : > { %s870_s16 = scalar_lea.sflag [#allocation4], %s869_s12 }
 0x5bf   : > { %p1098_p10 = pnand %p1101_p8, %p1400_p9 }
 0x5c1   : > { %1270 = dma.done.wait (!%p1098_p10), %s870_s16, 512  }
 0x5c2   : > { %1272 = vsyncadd (!%p1098_p10), %s870_s16, 4294966784  ;;  %s18_s25 = sadd.s32 1, %s1303_s25   ;;  %s1618_s30 = sld [smem:[#allocation6_spill]] }
 0x5c3   : > { %p15_p11 = scmp.ge.s32.totalorder %s18_s25, 10   ;;  %s1619_s13 = sld [smem:[#allocation7_spill]] }
 0x5c4   : > { %s1620_s18 = smov %s1279_s19  ;;  %s1621_s19 = smov %s1283_s20 }
 0x5c5   : > { %s1622_s20 = smov %s1408_s9  ;;  %s1623_s21 = smov %s1295_s23 }
 0x5c6   : > { %s1624_s22 = smov %s1299_s24  ;;  %17 = sbr.rel (!%p15_p11) target bundleno = 5 (0x5), region = 96 }
 0x5c8   : > { %s1625_s23 = smov %s1618_s30 }
 0x5c9   : > { %s1626_s24 = smov %s1619_s13 }
 0x5cd   :  { %875 = vsyncpa [#allocation4], 1 }
 0x5ce   :  { %877 = vsyncpa [#allocation4 + $0x1], 1 }

</bundles_post_ra>
